<compile_context>
chip_gen: v7x
topology: tpu7x:2x2x1
jax: 0.10.0
libtpu: 0.0.40
codegen_flags: <defaults>
</compile_context>

<pallas_src>
from functools import partial

import numpy as np
import jax
import jax.numpy as jnp
from jax.experimental import pallas as pl
from jax.experimental.pallas import tpu as pltpu

NEG_SLOPE = 0.01   # torch F.leaky_relu default negative_slope


def _round_up(x, m):
    return (x + m - 1) // m * m


def _pad2d(x, rows, cols):
    r, c = x.shape
    if r == rows and c == cols:
        return x
    return jnp.pad(x, ((0, rows - r), (0, cols - c)))


def _vmem_limit(est_bytes):
    # 2x margin on the block-budget estimate; floor above v5e's 16 MiB scoped
    # default, cap below v7x's 64 MiB physical VMEM.
    return int(min(max(2 * est_bytes, 16 * 1024 * 1024), 48 * 1024 * 1024))


def _pick_tiles(n_nodes, tile_m, tile_k):
    """Row / contraction tiles over the node axis and the padded node count.

    tile_m / tile_k should be power-of-two multiples of 128 (defaults are).
    """
    tm = min(tile_m, _round_up(n_nodes, 128))
    tk = min(tile_k, _round_up(n_nodes, 128))
    # v7x megacore: make sure the "parallel" row axis spans >= 2 tiles.
    if n_nodes > 128 and _round_up(n_nodes, tm) // tm < 2:
        tm = max(128, tm // 2)
    n_pad = _round_up(n_nodes, int(np.lcm(tm, tk)))
    return tm, tk, n_pad


# ----------------------------------------------------------------------------
# Kernel 1: row-tiled XW = X @ W  (the "combine" half of a hop, reassociated)
# ----------------------------------------------------------------------------
def _xw_kernel(x_ref, w_ref, o_ref):
    # x_ref: (tm, Dinp) bf16, w_ref: (Dinp, Doutp) bf16, o_ref: (tm, Doutp)
    o_ref[...] = jnp.dot(x_ref[...], w_ref[...],
                         preferred_element_type=jnp.float32).astype(o_ref.dtype)


def xw_matmul(x_p, w_p, *, tile_m, out_dtype=jnp.bfloat16):
    """Row-tiled X @ W with bf16 operands and f32 MXU accumulation."""
    Rp, Dinp = x_p.shape
    Dinp2, Doutp = w_p.shape
    assert Dinp == Dinp2 and Rp % tile_m == 0
    # TODO(synk): Din is kept as a single block (fits VMEM up to a few K dims);
    # very wide feature dims would need a k-tiled accumulator here too.
    out_bytes = jnp.dtype(out_dtype).itemsize
    est = (2 * (tile_m * Dinp + Dinp * Doutp) * 2
           + 2 * tile_m * Doutp * out_bytes)
    return pl.pallas_call(
        _xw_kernel,
        out_shape=jax.ShapeDtypeStruct((Rp, Doutp), out_dtype),
        grid_spec=pltpu.PrefetchScalarGridSpec(
            num_scalar_prefetch=0,
            grid=(Rp // tile_m,),
            in_specs=[
                pl.BlockSpec((tile_m, Dinp), lambda i: (i, 0)),
                pl.BlockSpec((Dinp, Doutp), lambda i: (0, 0)),
            ],
            out_specs=pl.BlockSpec((tile_m, Doutp), lambda i: (i, 0)),
        ),
        compiler_params=pltpu.CompilerParams(
            dimension_semantics=("parallel",),
            vmem_limit_bytes=_vmem_limit(est)),
    )(x_p, w_p)


# ----------------------------------------------------------------------------
# Kernel 2: leaky_relu(A_hat @ XW + b)  (mean aggregation + bias + activation)
# ----------------------------------------------------------------------------
def _agg_kernel(a_ref, xw_ref, b_ref, o_ref, acc_ref):
    # a_ref:   (tm, tk)     bf16  row-normalized adjacency tile
    # xw_ref:  (tk, Doutp)  bf16  pre-combined features (X @ W), k-slice
    # b_ref:   (1, Doutp)   f32   bias (folded into the accumulator init)
    # o_ref:   (tm, Doutp)        output tile
    # acc_ref: (tm, Doutp)  f32   accumulator
    k = pl.program_id(1)

    @pl.when(k == 0)
    def _():
        acc_ref[...] = jnp.broadcast_to(b_ref[...], acc_ref.shape)

    acc_ref[...] += jnp.dot(a_ref[...], xw_ref[...],
                            preferred_element_type=jnp.float32)

    @pl.when(k == pl.num_programs(1) - 1)
    def _():
        h = acc_ref[...]
        o_ref[...] = jnp.where(h > 0, h, NEG_SLOPE * h).astype(o_ref.dtype)


def aggregate(a_p, xw_p, b_p, *, tile_m, tile_k, out_dtype=jnp.bfloat16):
    """leaky_relu(A_hat @ XW + b): k-tiled aggregation with fused epilogue."""
    Rp, Kp = a_p.shape
    Kp2, Doutp = xw_p.shape
    assert Kp == Kp2 and Rp % tile_m == 0 and Kp % tile_k == 0
    out_bytes = jnp.dtype(out_dtype).itemsize
    est = (2 * (tile_m * tile_k + tile_k * Doutp) * 2   # bf16 inputs, dbl-buf
           + tile_m * Doutp * 4                          # f32 accumulator
           + 2 * tile_m * Doutp * out_bytes              # output, dbl-buf
           + 2 * Doutp * 4)                              # bias
    return pl.pallas_call(
        _agg_kernel,
        out_shape=jax.ShapeDtypeStruct((Rp, Doutp), out_dtype),
        grid_spec=pltpu.PrefetchScalarGridSpec(
            num_scalar_prefetch=0,
            grid=(Rp // tile_m, Kp // tile_k),
            in_specs=[
                pl.BlockSpec((tile_m, tile_k), lambda i, k: (i, k)),   # A tile
                pl.BlockSpec((tile_k, Doutp), lambda i, k: (k, 0)),    # XW
                pl.BlockSpec((1, Doutp), lambda i, k: (0, 0)),         # bias
            ],
            out_specs=pl.BlockSpec((tile_m, Doutp), lambda i, k: (i, 0)),
            scratch_shapes=[pltpu.VMEM((tile_m, Doutp), jnp.float32)],
        ),
        compiler_params=pltpu.CompilerParams(
            dimension_semantics=("parallel", "arbitrary"),
            vmem_limit_bytes=_vmem_limit(est)),
    )(a_p, xw_p, b_p)


# ----------------------------------------------------------------------------
# One-time setup (pad + bf16 cast hoisted out of the forward) and forward pass
# ----------------------------------------------------------------------------
def prepare_gcn(a_hat, feats, params, *, tile_m=512, tile_k=512):
    """Pad / cast the graph and params once ("graph construction" time)."""
    (w1, b1), (w2, b2) = params
    n_nodes = a_hat.shape[0]
    din = feats.shape[1]
    dh = w1.shape[1]
    tm, tk, n_pad = _pick_tiles(n_nodes, tile_m, tile_k)
    dinp = _round_up(din, 128)
    dhp = _round_up(dh, 128)

    prep = dict(
        a_p=_pad2d(a_hat, n_pad, n_pad).astype(jnp.bfloat16),
        x_p=_pad2d(feats, n_pad, dinp).astype(jnp.bfloat16),
        w1_p=_pad2d(w1, dinp, dhp).astype(jnp.bfloat16),
        b1_p=_pad2d(b1.reshape(1, -1).astype(jnp.float32), 1, dhp),
        a_f32=a_hat,          # unpadded f32 rows for the tiny hop-2 gather
        w2=w2, b2=b2,
    )
    static = dict(tm=tm, tk=tk, n=n_nodes, dh=dh)
    return prep, static


def gcn_conv_forward(label_idx, prep, *, tm, tk, n, dh):
    """GCNConv.forward: hop 1 in Pallas (reassociated), tiny hop 2 in XLA."""
    # hop 1 (inner gnn module, all nodes): h1 = leaky_relu(A @ (X @ W1) + b1)
    xw = xw_matmul(prep["x_p"], prep["w1_p"], tile_m=tm)                  # bf16
    h1 = aggregate(prep["a_p"], xw, prep["b1_p"], tile_m=tm, tile_k=tk,
                   out_dtype=jnp.bfloat16)                                # bf16

    # hop 2 (outer module == gnn_modules[-1]) only needs the label rows.
    # At O(10) labels this is ~0.4 MFLOP: a pallas_call launch + gather would
    # cost more than the math, so it stays in plain XLA, in f32.
    a_sel = jnp.take(prep["a_f32"], label_idx, axis=0)          # (L, N) f32
    h1f = h1[:n, :dh].astype(jnp.float32)
    h2 = (a_sel @ h1f) @ prep["w2"] + prep["b2"]
    return jnp.where(h2 > 0, h2, NEG_SLOPE * h2)


# ----------------------------------------------------------------------------
# Reference + demo
# ----------------------------------------------------------------------------
def _reference(label_idx, a_hat, feats, params):
    """Pure-JAX f32 reference of the module's eval-mode forward."""
    (w1, b1), (w2, b2) = params

    def hop(a, x, w, b):
        h = a @ x @ w + b
        return jnp.where(h > 0, h, NEG_SLOPE * h)

    h1 = hop(a_hat, feats, w1, b1)
    out = hop(a_hat, h1, w2, b2)
    return jnp.take(out, label_idx, axis=0)


def _build_adjacency(num_nodes):
    """Deterministic small graph -> dense row-normalized A_hat w/ self-loop."""
    adj_lists = {i: {(i + 1) % num_nodes,
                     (i + 3) % num_nodes,
                     (i + 7) % num_nodes} for i in range(num_nodes)}
    a = np.zeros((num_nodes, num_nodes), dtype=np.float32)
    for i, neighs in adj_lists.items():
        ns = set(neighs) | {i}          # agg_self_loop=True
        for j in ns:
            a[i, j] = 1.0 / len(ns)     # mean aggregator
    return jnp.asarray(a)


def _xavier_uniform(key, fan_in, fan_out):
    limit = float(np.sqrt(6.0 / (fan_in + fan_out)))
    return jax.random.uniform(key, (fan_in, fan_out), jnp.float32,
                              minval=-limit, maxval=limit)


if __name__ == "__main__":
    num_nodes = 256      # graph size
    input_dim = 256      # initial node embedding dim (features.size(1))
    hidden_dim = 128     # options['gnn'][1]['output_dim']
    label_dim = 128      # options['gnn'][0]['output_dim'] == label_dim
    num_labels = 8

    key = jax.random.PRNGKey(0)
    k_feat, k_w1, k_b1, k_w2, k_b2, k_idx = jax.random.split(key, 6)

    features = jax.random.normal(k_feat, (num_nodes, input_dim), jnp.float32)
    a_hat = _build_adjacency(num_nodes)

    # Combine layers' nn.Linear params (stored as [in_dim, out_dim])
    w1 = _xavier_uniform(k_w1, input_dim, hidden_dim)
    b1 = jax.random.uniform(k_b1, (hidden_dim,), jnp.float32, -0.01, 0.01)
    w2 = _xavier_uniform(k_w2, hidden_dim, label_dim)
    b2 = jax.random.uniform(k_b2, (label_dim,), jnp.float32, -0.01, 0.01)
    params = ((w1, b1), (w2, b2))

    label_idx = jax.random.randint(k_idx, (num_labels,), 0, num_nodes,
                                   jnp.int32)

    # One-time pad/cast (hoisted out of the jitted forward).
    prep, static = prepare_gcn(a_hat, features, params)
    fwd = jax.jit(partial(gcn_conv_forward,
                          tm=static["tm"], tk=static["tk"],
                          n=static["n"], dh=static["dh"]))

    out = jax.block_until_ready(fwd(label_idx, prep))

    assert out.shape == (num_labels, label_dim) and out.dtype == jnp.float32
    assert bool(jnp.all(jnp.isfinite(out)))

    ref = _reference(label_idx, a_hat, features, params)
    # bf16 matmul operands (f32 accumulation) -> loose tolerance vs f32 ref.
    assert bool(jnp.allclose(out, ref, rtol=0.1, atol=0.05)), (
        float(jnp.max(jnp.abs(out - ref))))

    print("KERNEL_OK")
</pallas_src>

<mosaic_0001>
module attributes {stable_mosaic.version = 11 : i64} {
  func.func @_agg_kernel(%arg0: i32, %arg1: i32, %arg2: memref<128x256xbf16, #tpu.memory_space<vmem>>, %arg3: memref<256x128xbf16, #tpu.memory_space<vmem>>, %arg4: memref<1x128xf32, #tpu.memory_space<vmem>>, %arg5: memref<128x128xbf16, #tpu.memory_space<vmem>>, %arg6: memref<128x128xf32, #tpu.memory_space<vmem>>) attributes {dimension_semantics = [#tpu.dimension_semantics<parallel>, #tpu.dimension_semantics<arbitrary>], iteration_bounds = array<i64: 2, 1>, scalar_prefetch = 0 : i64, scratch_operands = 1 : i64, tpu.core_type = #tpu.core_type<tc>, window_params = [{transform_indices = @transform_0, window_bounds = array<i64: 128, 256>}, {transform_indices = @transform_1, window_bounds = array<i64: 256, 128>}, {pipeline_mode = #tpu.pipeline_mode<synchronous>, transform_indices = @transform_2, window_bounds = array<i64: 1, 128>}, {transform_indices = @transform_3, window_bounds = array<i64: 128, 128>}]} {
    %c0_i32 = arith.constant 0 : i32
    %0 = arith.cmpi eq, %arg1, %c0_i32 : i32
    %1 = arith.extui %0 : i1 to i32
    %c0_i32_0 = arith.constant 0 : i32
    %2 = arith.cmpi ne, %1, %c0_i32_0 : i32
    scf.if %2 {
      %c0_10 = arith.constant 0 : index
      %c0_11 = arith.constant 0 : index
      %12 = vector.load %arg4[%c0_10, %c0_11] : memref<1x128xf32, #tpu.memory_space<vmem>>, vector<1x128xf32>
      %13 = vector.shape_cast %12 : vector<1x128xf32> to vector<1x128xf32>
      %14 = vector.broadcast %13 : vector<1x128xf32> to vector<128x128xf32>
      %c0_12 = arith.constant 0 : index
      %c0_13 = arith.constant 0 : index
      %15 = vector.load %arg6[%c0_12, %c0_13] : memref<128x128xf32, #tpu.memory_space<vmem>>, vector<128x128xf32>
      tpu.vector_store %arg6[%c0_12, %c0_13], %14 {strides = array<i32>} : memref<128x128xf32, #tpu.memory_space<vmem>>, vector<128x128xf32>,
    } else {
    }
    %c0 = arith.constant 0 : index
    %c0_1 = arith.constant 0 : index
    %3 = vector.load %arg6[%c0, %c0_1] : memref<128x128xf32, #tpu.memory_space<vmem>>, vector<128x128xf32>
    %c0_2 = arith.constant 0 : index
    %c0_3 = arith.constant 0 : index
    %4 = vector.load %arg2[%c0_2, %c0_3] : memref<128x256xbf16, #tpu.memory_space<vmem>>, vector<128x256xbf16>
    %c0_4 = arith.constant 0 : index
    %c0_5 = arith.constant 0 : index
    %5 = vector.load %arg3[%c0_4, %c0_5] : memref<256x128xbf16, #tpu.memory_space<vmem>>, vector<256x128xbf16>
    %cst = arith.constant dense<0.000000e+00> : vector<128x128xf32>
    %6 = tpu.matmul %4, %5, %cst {dimension_numbers = #tpu.dot_dimension_numbers<[1], [0], [0], [1], [0, 0, 1, 1], [], []>} : vector<128x256xbf16>, vector<256x128xbf16>, vector<128x128xf32> -> vector<128x128xf32>
    %7 = arith.addf %3, %6 : vector<128x128xf32>
    %c0_6 = arith.constant 0 : index
    %c0_7 = arith.constant 0 : index
    %8 = vector.load %arg6[%c0_6, %c0_7] : memref<128x128xf32, #tpu.memory_space<vmem>>, vector<128x128xf32>
    tpu.vector_store %arg6[%c0_6, %c0_7], %7 {strides = array<i32>} : memref<128x128xf32, #tpu.memory_space<vmem>>, vector<128x128xf32>,
    %c0_i32_8 = arith.constant 0 : i32
    %9 = arith.cmpi eq, %arg1, %c0_i32_8 : i32
    %10 = arith.extui %9 : i1 to i32
    %c0_i32_9 = arith.constant 0 : i32
    %11 = arith.cmpi ne, %10, %c0_i32_9 : i32
    scf.if %11 {
      %c0_10 = arith.constant 0 : index
      %c0_11 = arith.constant 0 : index
      %12 = vector.load %arg6[%c0_10, %c0_11] : memref<128x128xf32, #tpu.memory_space<vmem>>, vector<128x128xf32>
      %cst_12 = arith.constant 0.000000e+00 : f32
      %13 = vector.broadcast %cst_12 : f32 to vector<128x128xf32>
      %14 = arith.cmpf ogt, %12, %13 : vector<128x128xf32>
      %cst_13 = arith.constant 0.00999999977 : f32
      %15 = vector.broadcast %cst_13 : f32 to vector<128x128xf32>
      %16 = arith.mulf %15, %12 : vector<128x128xf32>
      %17 = arith.select %14, %12, %16 : vector<128x128xi1>, vector<128x128xf32>
      %18 = arith.truncf %17 : vector<128x128xf32> to vector<128x128xbf16>
      %c0_14 = arith.constant 0 : index
      %c0_15 = arith.constant 0 : index
      %19 = vector.load %arg5[%c0_14, %c0_15] : memref<128x128xbf16, #tpu.memory_space<vmem>>, vector<128x128xbf16>
      tpu.vector_store %arg5[%c0_14, %c0_15], %18 {strides = array<i32>} : memref<128x128xbf16, #tpu.memory_space<vmem>>, vector<128x128xbf16>,
    } else {
    }
    return
  }
  func.func @transform_0(%arg0: i32, %arg1: i32) -> (i32, i32) {
    %c0_i32 = arith.constant 0 : i32
    return %arg0, %arg1 : i32, i32
  }
  func.func @transform_1(%arg0: i32, %arg1: i32) -> (i32, i32) {
    %c0_i32 = arith.constant 0 : i32
    %c0_i32_0 = arith.constant 0 : i32
    return %arg1, %c0_i32 : i32, i32
  }
  func.func @transform_2(%arg0: i32, %arg1: i32) -> (i32, i32) {
    %c0_i32 = arith.constant 0 : i32
    %c0_i32_0 = arith.constant 0 : i32
    %c0_i32_1 = arith.constant 0 : i32
    return %c0_i32, %c0_i32_0 : i32, i32
  }
  func.func @transform_3(%arg0: i32, %arg1: i32) -> (i32, i32) {
    %c0_i32 = arith.constant 0 : i32
    %c0_i32_0 = arith.constant 0 : i32
    return %arg0, %c0_i32 : i32, i32
  }
}

module attributes {stable_mosaic.version = 11 : i64} {
  func.func @_xw_kernel(%arg0: i32, %arg1: memref<128x256xbf16, #tpu.memory_space<vmem>>, %arg2: memref<256x128xbf16, #tpu.memory_space<vmem>>, %arg3: memref<128x128xbf16, #tpu.memory_space<vmem>>) attributes {dimension_semantics = [#tpu.dimension_semantics<parallel>], iteration_bounds = array<i64: 2>, scalar_prefetch = 0 : i64, scratch_operands = 0 : i64, tpu.core_type = #tpu.core_type<tc>, window_params = [{transform_indices = @transform_0, window_bounds = array<i64: 128, 256>}, {pipeline_mode = #tpu.pipeline_mode<synchronous>, transform_indices = @transform_1, window_bounds = array<i64: 256, 128>}, {transform_indices = @transform_2, window_bounds = array<i64: 128, 128>}]} {
    %c0 = arith.constant 0 : index
    %c0_0 = arith.constant 0 : index
    %0 = vector.load %arg1[%c0, %c0_0] : memref<128x256xbf16, #tpu.memory_space<vmem>>, vector<128x256xbf16>
    %c0_1 = arith.constant 0 : index
    %c0_2 = arith.constant 0 : index
    %1 = vector.load %arg2[%c0_1, %c0_2] : memref<256x128xbf16, #tpu.memory_space<vmem>>, vector<256x128xbf16>
    %cst = arith.constant dense<0.000000e+00> : vector<128x128xf32>
    %2 = tpu.matmul %0, %1, %cst {dimension_numbers = #tpu.dot_dimension_numbers<[1], [0], [0], [1], [0, 0, 1, 1], [], []>} : vector<128x256xbf16>, vector<256x128xbf16>, vector<128x128xf32> -> vector<128x128xf32>
    %3 = arith.truncf %2 : vector<128x128xf32> to vector<128x128xbf16>
    %c0_3 = arith.constant 0 : index
    %c0_4 = arith.constant 0 : index
    %4 = vector.load %arg3[%c0_3, %c0_4] : memref<128x128xbf16, #tpu.memory_space<vmem>>, vector<128x128xbf16>
    tpu.vector_store %arg3[%c0_3, %c0_4], %3 {strides = array<i32>} : memref<128x128xbf16, #tpu.memory_space<vmem>>, vector<128x128xbf16>,
    return
  }
  func.func @transform_0(%arg0: i32) -> (i32, i32) {
    %c0_i32 = arith.constant 0 : i32
    %c0_i32_0 = arith.constant 0 : i32
    return %arg0, %c0_i32 : i32, i32
  }
  func.func @transform_1(%arg0: i32) -> (i32, i32) {
    %c0_i32 = arith.constant 0 : i32
    %c0_i32_0 = arith.constant 0 : i32
    %c0_i32_1 = arith.constant 0 : i32
    return %c0_i32, %c0_i32_0 : i32, i32
  }
  func.func @transform_2(%arg0: i32) -> (i32, i32) {
    %c0_i32 = arith.constant 0 : i32
    %c0_i32_0 = arith.constant 0 : i32
    return %arg0, %c0_i32 : i32, i32
  }
}

</mosaic_0001>

<bundles_post_ra>
// kernel: gcn_conv_forward.3
= control target key start
LH: loop header
LB: loop body
LE: loop exit
PB: predicated region body
PF: predicated region fallthrough
CT: control target
= control target key end

     0   :  { %s1028_s12 = smov 0   ;;  %s1030_s13 = smov 0   ;;  %s1162_s0 = inlined_call_operand.vmem [shape: bf16[256,256], index: 0, kind: input, shape index: {}]   ;;  %s1163_s1 = inlined_call_operand.vmem [shape: bf16[256,128], index: 1, kind: input, shape index: {}]   ;;  %s1164_s2 = inlined_call_operand.vmem [shape: f32[1,128], index: 2, kind: input, shape index: {}]   ;;  %s1165_s3 = inlined_call_operand.vmem [shape: bf16[256,128], index: 3, kind: output, shape index: {}]  }
   0x1   :  { %s1032_s14 = smov 0  }
   0x2 LB: > { %s25_s15 = sadd.s32 1, %s1002_s13  ;;  %p798_p0 = scmp.ge.s32.totalorder %s1006_s14, 1  ;;  %s1006_s14 = sphi %s1032_s14, %s13_s14   ;;  %s1002_s13 = sphi %s1030_s13, %s1167_s13   ;;  %s998_s12 = sphi %s1028_s12, %s1166_s12  }
   0x3   : > { %p27_p1 = scmp.ge.s32.totalorder %s25_s15, 2  ;;  %p169_p2 = scmp.lt.s32.totalorder %s1006_s14, 3 }
   0x5   : > { %s1169_s15 = smov (%p27_p1, %s25_s15), 0  ;;  %p170_p3 = pnand %p798_p0, %p169_p2 }
   0x6   : > { %v944_v0 = vld [vmem:[%s1163_s1 + $0x40] sm:$0xff] (!%p170_p3)   ;;  %s799_s18 = sshll.u32 (!%p170_p3), %s998_s12, 4  ;;  %v946_v2 = vld [vmem:[%s1163_s1 + $0x48] sm:$0xff] (!%p170_p3)   ;;  %v948_v4 = vld [vmem:[%s1163_s1 + $0x50] sm:$0xff] (!%p170_p3)   ;;  %s802_s30 = sshll.u32 (!%p170_p3), %s998_s12, 3 }
   0x7   : > { %173 = sbr.rel (%p170_p3) target bundleno = 289 (0x121), region = 32  ;;  %v945_v1 = vld [vmem:[%s1163_s1] sm:$0xff] (!%p170_p3)   ;;  %840 = vmatprep.subr.bf16.mxu0 (!%p170_p3), %v944_v0  ;;  %904 = vmatprep.subr.bf16.mxu1 (!%p170_p3), %v944_v0  ;;  %v947_v3 = vld [vmem:[%s1163_s1 + $0x8] sm:$0xff] (!%p170_p3)   ;;  %p205_p4 = scmp.lt.s32.totalorder (!%p170_p3), %s799_s18, 31  ;;  %v949_v5 = vld [vmem:[%s1163_s1 + $0x10] sm:$0xff] (!%p170_p3)  }
   0x8   : > { %841 = vmatpush3.bf16.msra.mxu0 (!%p170_p3), %v945_v1  ;;  %912 = vmatpush3.bf16.msra.mxu1 (!%p170_p3), %v945_v1  ;;  %v950_v6 = vld [vmem:[%s1163_s1 + $0x58] sm:$0xff] (!%p170_p3)   ;;  %v952_v8 = vld [vmem:[%s1163_s1 + $0x60] sm:$0xff] (!%p170_p3)   ;;  %v954_v10 = vld [vmem:[%s1163_s1 + $0x68] sm:$0xff] (!%p170_p3)   ;;  %p222_p5 = scmp.lt.s32.totalorder (!%p170_p3), %s802_s30, 15 }
   0x9   : > { %842 = vmatprep.subr.bf16.mxu0 (!%p170_p3), %v946_v2  ;;  %905 = vmatprep.subr.bf16.mxu1 (!%p170_p3), %v946_v2  ;;  %v951_v7 = vld [vmem:[%s1163_s1 + $0x18] sm:$0xff] (!%p170_p3)   ;;  %v953_v9 = vld [vmem:[%s1163_s1 + $0x20] sm:$0xff] (!%p170_p3)   ;;  %v955_v13 = vld [vmem:[%s1163_s1 + $0x28] sm:$0xff] (!%p170_p3)  }
   0xa   : > { %v956_v14 = vld [vmem:[%s1163_s1 + $0x70] sm:$0xff] (!%p170_p3)   ;;  %v958_v16 = vld [vmem:[%s1163_s1 + $0x78] sm:$0xff] (!%p170_p3)   ;;  %v1122_v34 = vld [vmem:[%s1164_s2] ss:$0 sm:$0xff] (!%p170_p3) }
   0xb   : > { %v957_v15 = vld [vmem:[%s1163_s1 + $0x30] sm:$0xff] (!%p170_p3)   ;;  %v959_v17 = vld [vmem:[%s1163_s1 + $0x38] sm:$0xff] (!%p170_p3)  }
   0xc   : > { %843 = vmatpush3.bf16.msra.mxu0 (!%p170_p3), %v947_v3  ;;  %913 = vmatpush3.bf16.msra.mxu1 (!%p170_p3), %v947_v3 }
   0xd   : > { %844 = vmatprep.subr.bf16.mxu0 (!%p170_p3), %v948_v4  ;;  %906 = vmatprep.subr.bf16.mxu1 (!%p170_p3), %v948_v4 }
   0xe   : > { %s1171_s18 = smov (!%p205_p4, %s799_s18), 31  ;;  %s1173_s30 = smov (!%p222_p5, %s802_s30), 15 }
   0xf   : > { %s839_s6 = sshll.u32 %s1171_s18, 3  ;;  %s803_s12 = sshll.u32 %s1173_s30, 3 }
  0x10   : > { %845 = vmatpush3.bf16.msra.mxu0 %v949_v5  ;;  %914 = vmatpush3.bf16.msra.mxu1 %v949_v5  ;;  %s1079_s11 = scalar_lea.vmem %s1162_s0, %s839_s6  ;;  %s1131_s8 = scalar_lea.vmem %s1165_s3, %s803_s12 }
  0x11   : > { %846 = vmatprep.subr.bf16.mxu0 %v950_v6  ;;  %907 = vmatprep.subr.bf16.mxu1 %v950_v6  ;;  %v962_v11 = vld [vmem:[%s1079_s11 + $0x4] ss:$8 sps:$4 sm:$0xff]   ;;  %v960_v18 = vld [vmem:[%s1079_s11] ss:$8 sps:$4 sm:$0xff]   ;;  %v966_v20 = vld [vmem:[%s1079_s11 + $0x14] ss:$8 sps:$4 sm:$0xff]  }
  0x12   : > { %v965_v12 = vld [vmem:[%s1079_s11 + $0x44] ss:$8 sps:$4 sm:$0xff]   ;;  %527 = vmatprep.mubr.bf16.mxu0 %v962_v11  ;;  %v963_v19 = vld [vmem:[%s1079_s11 + $0x40] ss:$8 sps:$4 sm:$0xff]   ;;  %v968_v21 = vld [vmem:[%s1079_s11 + $0x54] ss:$8 sps:$4 sm:$0xff]  }
  0x13   : > { %559 = vmatprep.mubr.bf16.mxu1 %v965_v12  ;;  %v970_v22 = vld [vmem:[%s1079_s11 + $0x10] ss:$8 sps:$4 sm:$0xff]   ;;  %v972_v24 = vld [vmem:[%s1079_s11 + $0x24] ss:$8 sps:$4 sm:$0xff]   ;;  %v976_v26 = vld [vmem:[%s1079_s11 + $0x20] ss:$8 sps:$4 sm:$0xff]  }
  0x14   : > { %847 = vmatpush3.bf16.msra.mxu0 %v951_v7  ;;  %915 = vmatpush3.bf16.msra.mxu1 %v951_v7  ;;  %v971_v23 = vld [vmem:[%s1079_s11 + $0x50] ss:$8 sps:$4 sm:$0xff]   ;;  %v974_v25 = vld [vmem:[%s1079_s11 + $0x64] ss:$8 sps:$4 sm:$0xff]   ;;  %v977_v27 = vld [vmem:[%s1079_s11 + $0x60] ss:$8 sps:$4 sm:$0xff]  }
  0x15   : > { %848 = vmatprep.subr.bf16.mxu0 %v952_v8  ;;  %908 = vmatprep.subr.bf16.mxu1 %v952_v8  ;;  %v978_v28 = vld [vmem:[%s1079_s11 + $0x34] ss:$8 sps:$4 sm:$0xff]   ;;  %v982_v30 = vld [vmem:[%s1079_s11 + $0x30] ss:$8 sps:$4 sm:$0xff]  }
  0x16   : > { %v980_v29 = vld [vmem:[%s1079_s11 + $0x74] ss:$8 sps:$4 sm:$0xff]   ;;  %v983_v31 = vld [vmem:[%s1079_s11 + $0x70] ss:$8 sps:$4 sm:$0xff]  }
  0x18   : > { %849 = vmatpush3.bf16.msra.mxu0 %v953_v9  ;;  %916 = vmatpush3.bf16.msra.mxu1 %v953_v9 }
  0x19   : > { %850 = vmatprep.subr.bf16.mxu0 %v954_v10  ;;  %909 = vmatprep.subr.bf16.mxu1 %v954_v10 }
  0x1c   : > { %851 = vmatpush3.bf16.msra.mxu0 %v955_v13  ;;  %917 = vmatpush3.bf16.msra.mxu1 %v955_v13 }
  0x1d   : > { %852 = vmatprep.subr.bf16.mxu0 %v956_v14  ;;  %910 = vmatprep.subr.bf16.mxu1 %v956_v14 }
  0x20   : > { %853 = vmatpush3.bf16.msra.mxu0 %v957_v15  ;;  %918 = vmatpush3.bf16.msra.mxu1 %v957_v15 }
  0x21   : > { %854 = vmatprep.subr.bf16.mxu0 %v958_v16  ;;  %911 = vmatprep.subr.bf16.mxu1 %v958_v16 }
  0x24   : > { %855 = vmatpush3.bf16.msra.mxu0 %v959_v17  ;;  %919 = vmatpush3.bf16.msra.mxu1 %v959_v17 }
  0x27   : > { %528 = vmatmul.mubr.bf16.vlgmr.msra.gmra.mrb[0].mxu0 %v960_v18  ;;  %560 = vmatmul.mubr.bf16.vlgmr.msra.gmra.mrb[0].mxu1 %v963_v19 }
  0x28   : > { %535 = vmatprep.mubr.bf16.mxu0 %v966_v20  ;;  %567 = vmatprep.mubr.bf16.mxu1 %v968_v21 }
  0x2f   : > { %536 = vmatmul.mubr.bf16.gmra.mrb[4].mxu0 %v970_v22  ;;  %568 = vmatmul.mubr.bf16.gmra.mrb[4].mxu1 %v971_v23 }
  0x30   : > { %543 = vmatprep.mubr.bf16.mxu0 %v972_v24  ;;  %575 = vmatprep.mubr.bf16.mxu1 %v974_v25 }
  0x37   : > { %544 = vmatmul.mubr.bf16.gmra.mrb[8].mxu0 %v976_v26  ;;  %576 = vmatmul.mubr.bf16.gmra.mrb[8].mxu1 %v977_v27 }
  0x38   : > { %551 = vmatprep.mubr.bf16.mxu0 %v978_v28  ;;  %583 = vmatprep.mubr.bf16.mxu1 %v980_v29 }
  0x3f   : > { %552 = vmatmul.mubr.bf16.gmra.mrb[12].mxu0 %v982_v30  ;;  %584 = vmatmul.mubr.bf16.gmra.mrb[12].mxu1 %v983_v31 }
  0xfa   : > { %v856_v32 = vpop.f32.mrb[0].mxu0  ;;  %v880_v33 = vpop.f32.mrb[0].mxu1 }
  0xfb   : > { %v857_v35 = vpop.f32.mrb[1].mxu0  ;;  %v881_v36 = vpop.f32.mrb[1].mxu1 }
  0xfc   : > { %v858_v37 = vadd.f32 %v857_v35, %v856_v32  ;;  %v882_v38 = vadd.f32 %v881_v36, %v880_v33  ;;  %v859_v39 = vpop.f32.mrb[2].mxu0  ;;  %v883_v40 = vpop.f32.mrb[2].mxu1 }
  0xfd   : > { %v860_v41 = vpop.f32.mrb[3].mxu0  ;;  %v884_v42 = vpop.f32.mrb[3].mxu1 }
  0xfe   : > { %v592_v43 = vadd.f32 %v858_v37, %v1122_v34  ;;  %v600_v44 = vadd.f32 %v882_v38, %v1122_v34  ;;  %v861_v45 = vadd.f32 %v860_v41, %v859_v39  ;;  %v885_v46 = vadd.f32 %v884_v42, %v883_v40 }
 0x100   : > { %v659_v47 = vmul.f32 0.01, %v592_v43  ;;  %v667_v48 = vmul.f32 0.01, %v600_v44  ;;  %vm643_vm0 = vcmp.gt.f32.partialorder %v592_v43, 0.0  ;;  %vm651_vm1 = vcmp.gt.f32.partialorder %v600_v44, 0.0 }
 0x101   : > { %v593_v49 = vadd.f32 %v861_v45, %v1122_v34  ;;  %v601_v50 = vadd.f32 %v885_v46, %v1122_v34 }
 0x102   : > { %v862_v51 = vpop.f32.mrb[4].mxu0  ;;  %v886_v52 = vpop.f32.mrb[4].mxu1  ;;  %v675_v55 = vsel %vm643_vm0, %v592_v43, %v659_v47  ;;  %v683_v56 = vsel %vm651_vm1, %v600_v44, %v667_v48 }
 0x103   : > { %vm644_vm2 = vcmp.gt.f32.partialorder %v593_v49, 0.0  ;;  %v660_v53 = vmul.f32 0.01, %v593_v49  ;;  %vm652_vm3 = vcmp.gt.f32.partialorder %v601_v50, 0.0  ;;  %v668_v54 = vmul.f32 0.01, %v601_v50 }
 0x104   : > { %v863_v57 = vpop.f32.mrb[5].mxu0  ;;  %v887_v58 = vpop.f32.mrb[5].mxu1 }
 0x105   : > { %v676_v59 = vsel %vm644_vm2, %v593_v49, %v660_v53  ;;  %v684_v60 = vsel %vm652_vm3, %v601_v50, %v668_v54  ;;  %v864_v61 = vadd.f32 %v863_v57, %v862_v51  ;;  %v888_v62 = vadd.f32 %v887_v58, %v886_v52  ;;  %v865_v63 = vpop.f32.mrb[6].mxu0  ;;  %v889_v0 = vpop.f32.mrb[6].mxu1 }
 0x106   : > { %v691_v1 = vpack.c.bf16 %v676_v59, %v675_v55  ;;  %v695_v2 = vpack.c.bf16 %v684_v60, %v683_v56  ;;  %v866_v3 = vpop.f32.mrb[7].mxu0  ;;  %v890_v4 = vpop.f32.mrb[7].mxu1 }
 0x107   : > { %v594_v5 = vadd.f32 %v864_v61, %v1122_v34  ;;  %v602_v6 = vadd.f32 %v888_v62, %v1122_v34  ;;  %v867_v7 = vadd.f32 %v866_v3, %v865_v63  ;;  %v891_v8 = vadd.f32 %v890_v4, %v889_v0 }
 0x108   : > { %699 = vst [vmem:[%s1131_s8] sm:$0xff] %v691_v1  ;;  %703 = vst [vmem:[%s1131_s8 + $0x20] sm:$0xff] %v695_v2 }
 0x109   : > { %v661_v9 = vmul.f32 0.01, %v594_v5  ;;  %v669_v10 = vmul.f32 0.01, %v602_v6  ;;  %v595_v11 = vadd.f32 %v867_v7, %v1122_v34  ;;  %v603_v12 = vadd.f32 %v891_v8, %v1122_v34 }
 0x10a   : > { %v868_v13 = vpop.f32.mrb[8].mxu0  ;;  %v892_v14 = vpop.f32.mrb[8].mxu1  ;;  %vm645_vm4 = vcmp.gt.f32.partialorder %v594_v5, 0.0  ;;  %vm653_vm5 = vcmp.gt.f32.partialorder %v602_v6, 0.0 }
 0x10b   : > { %v869_v15 = vpop.f32.mrb[9].mxu0  ;;  %v893_v16 = vpop.f32.mrb[9].mxu1  ;;  %vm646_vm6 = vcmp.gt.f32.partialorder %v595_v11, 0.0  ;;  %v662_v17 = vmul.f32 0.01, %v595_v11  ;;  %vm654_vm7 = vcmp.gt.f32.partialorder %v603_v12, 0.0  ;;  %v677_v23 = vsel %vm645_vm4, %v594_v5, %v661_v9 }
 0x10c   : > { %v670_v18 = vmul.f32 0.01, %v603_v12  ;;  %v870_v19 = vadd.f32 %v869_v15, %v868_v13  ;;  %v894_v20 = vadd.f32 %v893_v16, %v892_v14  ;;  %v871_v21 = vpop.f32.mrb[10].mxu0  ;;  %v895_v22 = vpop.f32.mrb[10].mxu1  ;;  %v685_v24 = vsel %vm653_vm5, %v602_v6, %v669_v10 }
 0x10d   : > { %v678_v25 = vsel %vm646_vm6, %v595_v11, %v662_v17  ;;  %v872_v27 = vpop.f32.mrb[11].mxu0  ;;  %v896_v28 = vpop.f32.mrb[11].mxu1 }
 0x10e   : > { %v686_v26 = vsel %vm654_vm7, %v603_v12, %v670_v18  ;;  %v692_v29 = vpack.c.bf16 %v678_v25, %v677_v23  ;;  %v596_v31 = vadd.f32 %v870_v19, %v1122_v34  ;;  %v604_v32 = vadd.f32 %v894_v20, %v1122_v34 }
 0x10f   : > { %v696_v30 = vpack.c.bf16 %v686_v26, %v685_v24  ;;  %v873_v33 = vadd.f32 %v872_v27, %v871_v21  ;;  %v897_v35 = vadd.f32 %v896_v28, %v895_v22 }
 0x110   : > { %700 = vst [vmem:[%s1131_s8 + $0x8] sm:$0xff] %v692_v29  ;;  %v663_v36 = vmul.f32 0.01, %v596_v31  ;;  %v671_v37 = vmul.f32 0.01, %v604_v32  ;;  %vm647_vm8 = vcmp.gt.f32.partialorder %v596_v31, 0.0 }
 0x111   : > { %704 = vst [vmem:[%s1131_s8 + $0x28] sm:$0xff] %v696_v30  ;;  %v597_v38 = vadd.f32 %v873_v33, %v1122_v34  ;;  %v605_v39 = vadd.f32 %v897_v35, %v1122_v34  ;;  %vm655_vm9 = vcmp.gt.f32.partialorder %v604_v32, 0.0 }
 0x112   : > { %v874_v40 = vpop.f32.mrb[12].mxu0  ;;  %v898_v41 = vpop.f32.mrb[12].mxu1  ;;  %v679_v50 = vsel %vm647_vm8, %v596_v31, %v663_v36  ;;  %v687_v51 = vsel %vm655_vm9, %v604_v32, %v671_v37 }
 0x113   : > { %v875_v42 = vpop.f32.mrb[13].mxu0  ;;  %v899_v43 = vpop.f32.mrb[13].mxu1  ;;  %vm648_vm10 = vcmp.gt.f32.partialorder %v597_v38, 0.0  ;;  %v664_v44 = vmul.f32 0.01, %v597_v38  ;;  %vm656_vm11 = vcmp.gt.f32.partialorder %v605_v39, 0.0 }
 0x114   : > { %v672_v45 = vmul.f32 0.01, %v605_v39  ;;  %v876_v46 = vadd.f32 %v875_v42, %v874_v40  ;;  %v900_v47 = vadd.f32 %v899_v43, %v898_v41  ;;  %v877_v48 = vpop.f32.mrb[14].mxu0  ;;  %v901_v49 = vpop.f32.mrb[14].mxu1 }
 0x115   : > { %v680_v52 = vsel %vm648_vm10, %v597_v38, %v664_v44  ;;  %v878_v54 = vpop.f32.mrb[15].mxu0  ;;  %v902_v55 = vpop.f32.mrb[15].mxu1 }
 0x116   : > { %v688_v53 = vsel %vm656_vm11, %v605_v39, %v672_v45  ;;  %v693_v56 = vpack.c.bf16 %v680_v52, %v679_v50  ;;  %v598_v58 = vadd.f32 %v876_v46, %v1122_v34  ;;  %v606_v59 = vadd.f32 %v900_v47, %v1122_v34 }
 0x117   : > { %v697_v57 = vpack.c.bf16 %v688_v53, %v687_v51  ;;  %v879_v60 = vadd.f32 %v878_v54, %v877_v48  ;;  %v903_v61 = vadd.f32 %v902_v55, %v901_v49 }
 0x118   : > { %701 = vst [vmem:[%s1131_s8 + $0x10] sm:$0xff] %v693_v56  ;;  %v665_v62 = vmul.f32 0.01, %v598_v58  ;;  %v673_v63 = vmul.f32 0.01, %v606_v59  ;;  %vm649_vm12 = vcmp.gt.f32.partialorder %v598_v58, 0.0 }
 0x119   : > { %705 = vst [vmem:[%s1131_s8 + $0x30] sm:$0xff] %v697_v57  ;;  %v599_v0 = vadd.f32 %v879_v60, %v1122_v34  ;;  %v607_v1 = vadd.f32 %v903_v61, %v1122_v34  ;;  %vm657_vm13 = vcmp.gt.f32.partialorder %v606_v59, 0.0 }
 0x11a   : > { %v681_v4 = vsel %vm649_vm12, %v598_v58, %v665_v62  ;;  %v689_v5 = vsel %vm657_vm13, %v606_v59, %v673_v63 }
 0x11b   : > { %vm650_vm14 = vcmp.gt.f32.partialorder %v599_v0, 0.0  ;;  %v666_v2 = vmul.f32 0.01, %v599_v0  ;;  %vm658_vm15 = vcmp.gt.f32.partialorder %v607_v1, 0.0  ;;  %v674_v3 = vmul.f32 0.01, %v607_v1 }
 0x11d   : > { %v682_v6 = vsel %vm650_vm14, %v599_v0, %v666_v2  ;;  %v690_v7 = vsel %vm658_vm15, %v607_v1, %v674_v3 }
 0x11e   : > { %v694_v8 = vpack.c.bf16 %v682_v6, %v681_v4  ;;  %v698_v9 = vpack.c.bf16 %v690_v7, %v689_v5 }
 0x120   : > { %702 = vst [vmem:[%s1131_s8 + $0x18] sm:$0xff] %v694_v8  ;;  %706 = vst [vmem:[%s1131_s8 + $0x38] sm:$0xff] %v698_v9 }
 0x121 PF: > { %s13_s14 = sadd.s32 1, %s1006_s14   ;;  %s1166_s12 = smov %s1002_s13 }
 0x122   : > { %p10_p6 = scmp.ge.s32.totalorder %s13_s14, 4   ;;  %s1167_s13 = smov %s1169_s15 }
 0x124   :  { %12 = sbr.rel (!%p10_p6) target bundleno = 2 (0x2), region = 73 }

// kernel: gcn_conv_forward.2
= control target key start
LH: loop header
LB: loop body
LE: loop exit
PB: predicated region body
PF: predicated region fallthrough
CT: control target
= control target key end

     0   :  { %7 = vsyncpa [#allocation3], 0  ;;  %s1256_s0 = inlined_call_operand.hbm [shape: bf16[256,256], index: 0, kind: input, shape index: {}]   ;;  %s1257_s1 = inlined_call_operand.hbm [shape: bf16[256,128], index: 1, kind: input, shape index: {}]   ;;  %s1258_s2 = inlined_call_operand.vmem [shape: bf16[256,128], index: 2, kind: output, shape index: {}]  }
   0x1   :  { %9 = vsyncpa [#allocation3 + $0x1], 0 }
   0x2   :  { %10 = vsyncpa [#allocation5], 0  ;;  %s1083_s9 = smov 0   ;;  %s1085_s10 = smov 0  }
   0x3   :  { %s1087_s11 = smov 0   ;;  %s1089_s12 = smov 0  }
   0x4 LB: > { %s661_s13 = sadd.s32 4294967295, %s1060_s12   ;;  %p36_p0 = scmp.ne.s32.totalorder %s1052_s10, %s1048_s9  ;;  %s1060_s12 = sphi %s1089_s12, %s1274_s12   ;;  %s1056_s11 = sphi %s1087_s11, %s1273_s11   ;;  %s1052_s10 = sphi %s1085_s10, %s1272_s10   ;;  %s1048_s9 = sphi %s1083_s9, %s1271_s9  }
   0x5   : > { %p1105_p1 = scmp.eq.s32.totalorder %s661_s13, 0  ;;  %p663_p2 = scmp.ge.s32.totalorder %s1060_s12, 1 }
   0x6   : > { %p94_p3 = scmp.lt.s32.totalorder %s1060_s12, 3  ;;  %s1062_s17 = smov [#allocation4]  }
   0x7   : > { %s1263_s14 = scalar_select %p1105_p1, 1, 0 }
   0x8   : > { %p1113_p4 = por %p1105_p1, %p36_p0  ;;  %p1117_p5 = pnand %p663_p2, %p94_p3 }
   0x9   : > { %s106_s18 = sshll.u32 %s1062_s17, 4  ;;  %s1130_s20 = sadd.s32 1, %s1060_s12   ;;  %s107_s18 = int_to_ptr.vmem [resolvable:$true] %s106_s18 }
   0xa   : > { %s1264_s15 = scalar_select %p1113_p4, 1, 0 }
   0xb   : > { %s1265_s16 = scalar_select %p1117_p5, 1, 0 }
   0xc   : > { %p876_p6 = pneg %p1117_p5  ;;  %s23_s21 = sadd.s32 1, %s1056_s11 }
   0xd   : > { %s20_s22 = ssub.s32 %s1060_s12, %s1130_s20  ;;  %s964_s25 = scalar_lea.hbm %s1257_s1, 2048 }
   0xe   : > { %p1125_p7 = pnand %p876_p6, %p1105_p1  ;;  %p965_p8 = scmp.ne.s32.totalorder %s1257_s1, %s964_s25 }
   0xf   : > { %p971_p12 = scmp.lt.u32.totalorder %s964_s25, %s1257_s1 }
  0x10   : > { %p966_p9 = pneg %p1125_p7 }
  0x12   : > { %p967_p10 = pnand %p966_p9, %p965_p8 }
  0x14   : > { %p968_p11 = pneg %p967_p10 }
  0x16   : > { %p973_p13 = pnand %p971_p12, %p968_p11 }
  0x18   : > { %976 = shalt.err (!%p973_p13)
}
  0x19   : > { %s977_s30 = scalar_lea.vmem %s107_s18, 2048  ;;  %p985_p6 = scmp.lt.s32.totalorder %s107_s18, %s107_s18 }
  0x1a   : > { %p978_p0 = scmp.ne.s32.totalorder %s107_s18, %s977_s30  ;;  %p986_p1 = scmp.lt.s32.totalorder %s977_s30, %s977_s30 }
  0x1c   : > { %p980_p2 = pnand %p978_p0, %p966_p9  ;;  %p987_p4 = por %p986_p1, %p985_p6 }
  0x1e   : > { %p981_p3 = pneg %p980_p2 }
  0x20   : > { %p988_p5 = pnand %p987_p4, %p981_p3 }
  0x22   : > { %991 = shalt.err (!%p988_p5)
}
  0x23   : > { %s1063_s3 = smov 64   ;;  %s1064_s4 = smov 4  }
  0x24   : > { %879 = dma.hbm_to_vmem [thread:$0]  (!%p1125_p7), %s1257_s1, 2048, %s107_s18, [#allocation5], %s1063_s3, %s1063_s3, %s1064_s4  }
  0x25   : > { %p21_p8 = scmp.eq.s32.totalorder %s20_s22, 0  ;;  %p30_p9 = scmp.ne.s32.totalorder %s1056_s11, %s1052_s10 }
  0x26   : > { %p31_p1 = scmp.eq.s32.totalorder %s1060_s12, 0  ;;  %p885_p4 = scmp.lt.s32.totalorder %s1060_s12, 2 }
  0x27   : > { %s1156_s7 = scalar_select %p21_p8, %s1056_s11, %s23_s21  }
  0x28   : > { %p32_p5 = por %p31_p1, %p30_p9  ;;  %s120_s8 = sand.u32 1, %s1056_s11  }
  0x29   : > { %s666_s9 = sshll.u32 %s120_s8, 7  ;;  %s726_s17 = sshll.u32 %s1060_s12, 11 }
  0x2a   : > { %s1163_s25 = scalar_lea.hbm %s1256_s0, %s726_s17  ;;  %s124_s18 = scalar_lea.vmem [#allocation2], %s666_s9 }
  0x2b   : > { %s132_s19 = sshll.u32 %s124_s18, 4  ;;  %p1167_p7 = pnand %p885_p4, %p32_p5  ;;  %s1165_s19 = int_to_ptr.vmem [resolvable:$true] %s132_s19 }
  0x2c   : > { %s1171_s22 = scalar_lea.sflag [#allocation3], %s120_s8  ;;  %s992_s26 = scalar_lea.hbm %s1163_s25, 2048 }
  0x2d   : > { %p993_p10 = scmp.ne.s32.totalorder %s1163_s25, %s992_s26  ;;  %p994_p11 = pneg %p1167_p7 }
  0x2e   : > { %s997_s29 = scalar_lea.hbm %s1256_s0, 4096  ;;  %p998_p0 = scmp.lt.u32.totalorder %s1163_s25, %s1256_s0 }
  0x2f   : > { %p995_p12 = pnand %p994_p11, %p993_p10  ;;  %p999_p2 = scmp.lt.u32.totalorder %s997_s29, %s992_s26 }
  0x30   : > { %p1001_p6 = scmp.lt.u32.totalorder %s992_s26, %s1163_s25 }
  0x31   : > { %p996_p13 = pneg %p995_p12  ;;  %p1000_p3 = por %p999_p2, %p998_p0 }
  0x33   : > { %p1002_p8 = por %p1001_p6, %p1000_p3 }
  0x35   : > { %p1003_p9 = pnand %p1002_p8, %p996_p13 }
  0x37   : > { %1006 = shalt.err (!%p1003_p9)
}
  0x38   : > { %s1007_s4 = scalar_lea.vmem %s1165_s19, 2048  ;;  %s1065_s5 = smov [#allocation2]  }
  0x39   : > { %p1008_p1 = scmp.ne.s32.totalorder %s1165_s19, %s1007_s4  ;;  %s1012_s6 = sshll.u32 %s1065_s5, 4  ;;  %s1013_s6 = int_to_ptr.vmem [resolvable:$false] %s1012_s6 }
  0x3a   : > { %s1014_s8 = scalar_lea.vmem %s1013_s6, 4096  ;;  %p1015_p10 = scmp.lt.s32.totalorder %s1165_s19, %s1013_s6 }
  0x3b   : > { %p1010_p4 = pnand %p1008_p1, %p994_p11  ;;  %p1016_p12 = scmp.lt.s32.totalorder %s1014_s8, %s1007_s4 }
  0x3d   : > { %p1011_p5 = pneg %p1010_p4  ;;  %p1017_p0 = por %p1016_p12, %p1015_p10 }
  0x3f   : > { %p1018_p2 = pnand %p1017_p0, %p1011_p5 }
  0x41   : > { %1021 = shalt.err (!%p1018_p2)
}
  0x42   : > { %s1066_s9 = smov 128   ;;  %s1067_s17 = smov 8  }
  0x43   : > { %883 = dma.hbm_to_vmem [thread:$0]  (!%p1167_p7), %s1163_s25, 2048, %s1165_s19, %s1171_s22, %s1066_s9, %s1066_s9, %s1067_s17  }
  0x44   : > { %p1268_p11 = scmp.ne.s32.totalorder %s1265_s16, 0 }
  0x45   : > { %s146_s23 = sand.u32 (!%p1268_p11), 1, %s1052_s10   ;;  %p1269_p13 = scmp.ne.s32.totalorder (!%p1268_p11), %s1264_s15, 0 }
  0x46   : > { %144 = sbr.rel (%p1268_p11) target bundleno = 358 (0x166), region = 28  ;;  %s671_s24 = sshll.u32 (!%p1268_p11), %s146_s23, 7 }
  0x47   : > { %s147_s18 = scalar_lea.sflag (!%p1268_p11), [#allocation3], %s146_s23  ;;  %s1202_s26 = scalar_lea.vmem (!%p1268_p11), [#allocation2], %s671_s24 }
  0x4d   : > { %1039 = dma.done.wait (%p1269_p13), %s147_s18, 2048  }
  0x4e   : > { %1041 = vsyncadd (%p1269_p13), %s147_s18, 4294965248  ;;  %p1270_p3 = scmp.ne.s32.totalorder %s1263_s14, 0 }
  0x50   : > { %1043 = dma.done.wait (%p1270_p3), [#allocation5], 2048  }
  0x51   : > { %1045 = vsyncadd (%p1270_p3), [#allocation5], 4294965248  ;;  %v924_v0 = vld [vmem:[#allocation4 + $0x40] sm:$0xff]   ;;  %v926_v2 = vld [vmem:[#allocation4 + $0x48] sm:$0xff]   ;;  %s673_s14 = sshll.u32 %s661_s13, 4 }
  0x52   : > { %v925_v1 = vld [vmem:[#allocation4] sm:$0xff]   ;;  %790 = vmatprep.subr.bf16.mxu0 %v924_v0  ;;  %854 = vmatprep.subr.bf16.mxu1 %v924_v0  ;;  %v927_v3 = vld [vmem:[#allocation4 + $0x8] sm:$0xff]   ;;  %v928_v4 = vld [vmem:[#allocation4 + $0x50] sm:$0xff]   ;;  %p177_p7 = scmp.lt.s32.totalorder %s673_s14, 31 }
  0x53   : > { %791 = vmatpush3.bf16.msra.mxu0 %v925_v1  ;;  %862 = vmatpush3.bf16.msra.mxu1 %v925_v1  ;;  %v929_v5 = vld [vmem:[#allocation4 + $0x10] sm:$0xff]   ;;  %v930_v6 = vld [vmem:[#allocation4 + $0x58] sm:$0xff]   ;;  %v932_v8 = vld [vmem:[#allocation4 + $0x60] sm:$0xff]  }
  0x54   : > { %792 = vmatprep.subr.bf16.mxu0 %v926_v2  ;;  %855 = vmatprep.subr.bf16.mxu1 %v926_v2  ;;  %v931_v7 = vld [vmem:[#allocation4 + $0x18] sm:$0xff]   ;;  %v933_v9 = vld [vmem:[#allocation4 + $0x20] sm:$0xff]   ;;  %v934_v10 = vld [vmem:[#allocation4 + $0x68] sm:$0xff]   ;;  %s1276_s14 = smov (!%p177_p7, %s673_s14), 31 }
  0x55   : > { %v942_v11 = vld [vmem:[%s1202_s26 + $0x4] ss:$8 sps:$4 sm:$0xff]   ;;  %v936_v14 = vld [vmem:[#allocation4 + $0x70] sm:$0xff]   ;;  %v938_v16 = vld [vmem:[#allocation4 + $0x78] sm:$0xff]   ;;  %s674_s15 = sshll.u32 %s1276_s14, 2 }
  0x56   : > { %v945_v12 = vld [vmem:[%s1202_s26 + $0x44] ss:$8 sps:$4 sm:$0xff]   ;;  %439 = vmatprep.mubr.bf16.mxu0 %v942_v11  ;;  %v937_v15 = vld [vmem:[#allocation4 + $0x30] sm:$0xff]   ;;  %v939_v17 = vld [vmem:[#allocation4 + $0x38] sm:$0xff]   ;;  %s1233_s12 = scalar_lea.vmem %s1258_s2, %s674_s15 }
  0x57   : > { %793 = vmatpush3.bf16.msra.mxu0 %v927_v3  ;;  %863 = vmatpush3.bf16.msra.mxu1 %v927_v3  ;;  %v935_v13 = vld [vmem:[#allocation4 + $0x28] sm:$0xff]   ;;  %v946_v20 = vld [vmem:[%s1202_s26 + $0x14] ss:$8 sps:$4 sm:$0xff]   ;;  %v950_v22 = vld [vmem:[%s1202_s26 + $0x10] ss:$8 sps:$4 sm:$0xff]  }
  0x58   : > { %794 = vmatprep.subr.bf16.mxu0 %v928_v4  ;;  %856 = vmatprep.subr.bf16.mxu1 %v928_v4  ;;  %v940_v18 = vld [vmem:[%s1202_s26] ss:$8 sps:$4 sm:$0xff]   ;;  %v948_v21 = vld [vmem:[%s1202_s26 + $0x54] ss:$8 sps:$4 sm:$0xff]   ;;  %v951_v23 = vld [vmem:[%s1202_s26 + $0x50] ss:$8 sps:$4 sm:$0xff]  }
  0x59   : > { %471 = vmatprep.mubr.bf16.mxu1 %v945_v12  ;;  %v943_v19 = vld [vmem:[%s1202_s26 + $0x40] ss:$8 sps:$4 sm:$0xff]   ;;  %v952_v24 = vld [vmem:[%s1202_s26 + $0x24] ss:$8 sps:$4 sm:$0xff]   ;;  %v958_v28 = vld [vmem:[%s1202_s26 + $0x34] ss:$8 sps:$4 sm:$0xff]  }
  0x5a   : > { %v954_v25 = vld [vmem:[%s1202_s26 + $0x64] ss:$8 sps:$4 sm:$0xff]   ;;  %v956_v26 = vld [vmem:[%s1202_s26 + $0x20] ss:$8 sps:$4 sm:$0xff]   ;;  %v960_v29 = vld [vmem:[%s1202_s26 + $0x74] ss:$8 sps:$4 sm:$0xff]  }
  0x5b   : > { %795 = vmatpush3.bf16.msra.mxu0 %v929_v5  ;;  %864 = vmatpush3.bf16.msra.mxu1 %v929_v5  ;;  %v957_v27 = vld [vmem:[%s1202_s26 + $0x60] ss:$8 sps:$4 sm:$0xff]   ;;  %v962_v30 = vld [vmem:[%s1202_s26 + $0x30] ss:$8 sps:$4 sm:$0xff]  }
  0x5c   : > { %796 = vmatprep.subr.bf16.mxu0 %v930_v6  ;;  %857 = vmatprep.subr.bf16.mxu1 %v930_v6  ;;  %v963_v31 = vld [vmem:[%s1202_s26 + $0x70] ss:$8 sps:$4 sm:$0xff]  }
  0x5f   : > { %797 = vmatpush3.bf16.msra.mxu0 %v931_v7  ;;  %865 = vmatpush3.bf16.msra.mxu1 %v931_v7 }
  0x60   : > { %798 = vmatprep.subr.bf16.mxu0 %v932_v8  ;;  %858 = vmatprep.subr.bf16.mxu1 %v932_v8 }
  0x63   : > { %799 = vmatpush3.bf16.msra.mxu0 %v933_v9  ;;  %866 = vmatpush3.bf16.msra.mxu1 %v933_v9 }
  0x64   : > { %800 = vmatprep.subr.bf16.mxu0 %v934_v10  ;;  %859 = vmatprep.subr.bf16.mxu1 %v934_v10 }
  0x67   : > { %801 = vmatpush3.bf16.msra.mxu0 %v935_v13  ;;  %867 = vmatpush3.bf16.msra.mxu1 %v935_v13 }
  0x68   : > { %802 = vmatprep.subr.bf16.mxu0 %v936_v14  ;;  %860 = vmatprep.subr.bf16.mxu1 %v936_v14 }
  0x6b   : > { %803 = vmatpush3.bf16.msra.mxu0 %v937_v15  ;;  %868 = vmatpush3.bf16.msra.mxu1 %v937_v15 }
  0x6c   : > { %804 = vmatprep.subr.bf16.mxu0 %v938_v16  ;;  %861 = vmatprep.subr.bf16.mxu1 %v938_v16 }
  0x6f   : > { %805 = vmatpush3.bf16.msra.mxu0 %v939_v17  ;;  %869 = vmatpush3.bf16.msra.mxu1 %v939_v17 }
  0x72   : > { %440 = vmatmul.mubr.bf16.vlgmr.msra.gmra.mrb[0].mxu0 %v940_v18  ;;  %472 = vmatmul.mubr.bf16.vlgmr.msra.gmra.mrb[0].mxu1 %v943_v19 }
  0x73   : > { %447 = vmatprep.mubr.bf16.mxu0 %v946_v20  ;;  %479 = vmatprep.mubr.bf16.mxu1 %v948_v21 }
  0x7a   : > { %448 = vmatmul.mubr.bf16.gmra.mrb[4].mxu0 %v950_v22  ;;  %480 = vmatmul.mubr.bf16.gmra.mrb[4].mxu1 %v951_v23 }
  0x7b   : > { %455 = vmatprep.mubr.bf16.mxu0 %v952_v24  ;;  %487 = vmatprep.mubr.bf16.mxu1 %v954_v25 }
  0x82   : > { %456 = vmatmul.mubr.bf16.gmra.mrb[8].mxu0 %v956_v26  ;;  %488 = vmatmul.mubr.bf16.gmra.mrb[8].mxu1 %v957_v27 }
  0x83   : > { %463 = vmatprep.mubr.bf16.mxu0 %v958_v28  ;;  %495 = vmatprep.mubr.bf16.mxu1 %v960_v29 }
  0x8a   : > { %464 = vmatmul.mubr.bf16.gmra.mrb[12].mxu0 %v962_v30  ;;  %496 = vmatmul.mubr.bf16.gmra.mrb[12].mxu1 %v963_v31 }
 0x145   : > { %v806_v32 = vpop.f32.mrb[0].mxu0  ;;  %v830_v33 = vpop.f32.mrb[0].mxu1 }
 0x146   : > { %v807_v34 = vpop.f32.mrb[1].mxu0  ;;  %v831_v35 = vpop.f32.mrb[1].mxu1 }
 0x147   : > { %v808_v36 = vadd.f32 %v807_v34, %v806_v32  ;;  %v832_v37 = vadd.f32 %v831_v35, %v830_v33  ;;  %v809_v38 = vpop.f32.mrb[2].mxu0  ;;  %v833_v39 = vpop.f32.mrb[2].mxu1 }
 0x148   : > { %v810_v40 = vpop.f32.mrb[3].mxu0  ;;  %v834_v41 = vpop.f32.mrb[3].mxu1 }
 0x149   : > { %v811_v42 = vadd.f32 %v810_v40, %v809_v38  ;;  %v835_v43 = vadd.f32 %v834_v41, %v833_v39 }
 0x14b   : > { %v746_v44 = vpack.c.bf16 %v811_v42, %v808_v36  ;;  %v766_v45 = vpack.c.bf16 %v835_v43, %v832_v37 }
 0x14d   : > { %747 = vst [vmem:[%s1233_s12] sm:$0xff] %v746_v44   ;;  %786 = vst [vmem:[%s1233_s12 + $0x20] sm:$0xff] %v766_v45   ;;  %v812_v46 = vpop.f32.mrb[4].mxu0  ;;  %v836_v47 = vpop.f32.mrb[4].mxu1 }
 0x14e   : > { %v813_v48 = vpop.f32.mrb[5].mxu0  ;;  %v837_v49 = vpop.f32.mrb[5].mxu1 }
 0x14f   : > { %v814_v50 = vadd.f32 %v813_v48, %v812_v46  ;;  %v838_v51 = vadd.f32 %v837_v49, %v836_v47  ;;  %v815_v52 = vpop.f32.mrb[6].mxu0  ;;  %v839_v53 = vpop.f32.mrb[6].mxu1 }
 0x150   : > { %v816_v54 = vpop.f32.mrb[7].mxu0  ;;  %v840_v55 = vpop.f32.mrb[7].mxu1 }
 0x151   : > { %v817_v56 = vadd.f32 %v816_v54, %v815_v52  ;;  %v841_v57 = vadd.f32 %v840_v55, %v839_v53 }
 0x153   : > { %v751_v58 = vpack.c.bf16 %v817_v56, %v814_v50  ;;  %v771_v59 = vpack.c.bf16 %v841_v57, %v838_v51 }
 0x155   : > { %783 = vst [vmem:[%s1233_s12 + $0x8] sm:$0xff] %v751_v58   ;;  %787 = vst [vmem:[%s1233_s12 + $0x28] sm:$0xff] %v771_v59   ;;  %v818_v60 = vpop.f32.mrb[8].mxu0  ;;  %v842_v61 = vpop.f32.mrb[8].mxu1 }
 0x156   : > { %v819_v62 = vpop.f32.mrb[9].mxu0  ;;  %v843_v63 = vpop.f32.mrb[9].mxu1 }
 0x157   : > { %v820_v0 = vadd.f32 %v819_v62, %v818_v60  ;;  %v844_v1 = vadd.f32 %v843_v63, %v842_v61  ;;  %v821_v2 = vpop.f32.mrb[10].mxu0  ;;  %v845_v3 = vpop.f32.mrb[10].mxu1 }
 0x158   : > { %v822_v4 = vpop.f32.mrb[11].mxu0  ;;  %v846_v5 = vpop.f32.mrb[11].mxu1 }
 0x159   : > { %v823_v6 = vadd.f32 %v822_v4, %v821_v2  ;;  %v847_v7 = vadd.f32 %v846_v5, %v845_v3 }
 0x15b   : > { %v756_v8 = vpack.c.bf16 %v823_v6, %v820_v0  ;;  %v776_v9 = vpack.c.bf16 %v847_v7, %v844_v1 }
 0x15d   : > { %784 = vst [vmem:[%s1233_s12 + $0x10] sm:$0xff] %v756_v8   ;;  %788 = vst [vmem:[%s1233_s12 + $0x30] sm:$0xff] %v776_v9   ;;  %v824_v10 = vpop.f32.mrb[12].mxu0  ;;  %v848_v11 = vpop.f32.mrb[12].mxu1 }
 0x15e   : > { %v825_v12 = vpop.f32.mrb[13].mxu0  ;;  %v849_v13 = vpop.f32.mrb[13].mxu1 }
 0x15f   : > { %v826_v14 = vadd.f32 %v825_v12, %v824_v10  ;;  %v850_v15 = vadd.f32 %v849_v13, %v848_v11  ;;  %v827_v16 = vpop.f32.mrb[14].mxu0  ;;  %v851_v17 = vpop.f32.mrb[14].mxu1 }
 0x160   : > { %v828_v18 = vpop.f32.mrb[15].mxu0  ;;  %v852_v19 = vpop.f32.mrb[15].mxu1 }
 0x161   : > { %v829_v20 = vadd.f32 %v828_v18, %v827_v16  ;;  %v853_v21 = vadd.f32 %v852_v19, %v851_v17 }
 0x163   : > { %v761_v22 = vpack.c.bf16 %v829_v20, %v826_v14  ;;  %v781_v23 = vpack.c.bf16 %v853_v21, %v850_v15 }
 0x165   : > { %785 = vst [vmem:[%s1233_s12 + $0x18] sm:$0xff] %v761_v22   ;;  %789 = vst [vmem:[%s1233_s12 + $0x38] sm:$0xff] %v781_v23  }
 0x166 PF: > { %p13_p6 = scmp.ge.s32.totalorder %s1130_s20, 4   ;;  %s1271_s9 = smov %s1052_s10 }
 0x167   : > { %s1272_s10 = smov %s1056_s11  ;;  %s1273_s11 = smov %s1156_s7 }
 0x168   : > { %s1274_s12 = smov %s1130_s20  ;;  %15 = sbr.rel (!%p13_p6) target bundleno = 4 (0x4), region = 72 }
 0x16f   :  { %606 = vsyncpa [#allocation3], 1 }
 0x170   :  { %608 = vsyncpa [#allocation3 + $0x1], 1 }
 0x171   :  { %609 = vsyncpa [#allocation5], 1 }

</bundles_post_ra>
